<compile_context>
chip_gen: v6e
topology: v6e:2x2x1
jax: 0.10.0
libtpu: 0.0.40
codegen_flags: <defaults>
</compile_context>

<pallas_src>
import functools
import math

import jax
import jax.numpy as jnp
from jax.experimental import pallas as pl
from jax.experimental.pallas import tpu as pltpu  # noqa: F401  (imported per convention)

D_MODEL = 32
NHEAD = 4
HEAD_DIM = D_MODEL // NHEAD
DIM_FF = 64
LN_EPS = 1e-5
NEG_INF = -1e30


# --------------------------------------------------------------------------- kernel
def encoder_layer_kernel(src_ref, pos_ref, wqk_ref, wv_ref, wo_ref, w1_ref, w2_ref,
                         vec_ref, out_ref, *, batch: int):
    N, D = src_ref.shape
    H, HD = NHEAD, HEAD_DIM
    F = w1_ref.shape[1]

    src = src_ref[...]                       # (N, D) f32
    pos = pos_ref[...]                       # (N, D) f32

    # ---- packed bias / LN vectors (hoisted once; all static slices) ----
    vec = vec_ref[...]                       # (8, max(2D, F)) f32
    b_qk = vec[0:1, 0:2 * D]                 # (1, 2D)  [b_q(scaled) | b_k]
    b1 = vec[1:2, 0:F]                       # (1, F)
    b_v = vec[2:3, 0:D]
    b_o = vec[3:4, 0:D]
    b2 = vec[4:5, 0:D]
    ln_w = vec[5:6, 0:D]
    ln_b = vec[6:7, 0:D]

    # ---- Q|K and V projections: two lane-dense matmuls (bf16 in, f32 accumulate) ----
    x_qk = (src + pos).astype(jnp.bfloat16)
    qk = jnp.dot(x_qk, wqk_ref[...], preferred_element_type=jnp.float32) + b_qk   # (N, 2D)
    v = jnp.dot(src.astype(jnp.bfloat16), wv_ref[...],
                preferred_element_type=jnp.float32) + b_v                         # (N, D)

    # ---- block-diagonal additive mask generated in-kernel (row n belongs to batch n%B) ----
    row = jax.lax.broadcasted_iota(jnp.int32, (N, N), 0)
    col = jax.lax.broadcasted_iota(jnp.int32, (N, N), 1)
    mask = jnp.where((row % batch) == (col % batch), 0.0, NEG_INF)                # (N, N) f32

    qk_bf = qk.astype(jnp.bfloat16)
    v_bf = v.astype(jnp.bfloat16)
    contract_last = (((1,), (1,)), ((), ()))   # q @ k^T without an explicit transpose

    # ---- per-head attention (static unrolled loop, 2-D ops only) ----
    o_heads = []
    for h in range(H):
        q_h = qk_bf[:, h * HD:(h + 1) * HD]               # (N, HD)  scale already folded
        k_h = qk_bf[:, D + h * HD:D + (h + 1) * HD]       # (N, HD)
        v_h = v_bf[:, h * HD:(h + 1) * HD]                # (N, HD)

        s = jax.lax.dot_general(q_h, k_h, contract_last,
                                preferred_element_type=jnp.float32) + mask        # (N, N)
        s = s - jnp.max(s, axis=-1, keepdims=True)
        e = jnp.exp(s)                                                            # f32
        denom = jnp.sum(e, axis=-1, keepdims=True)                                # (N, 1)
        o_h = jnp.dot(e.astype(jnp.bfloat16), v_h,
                      preferred_element_type=jnp.float32)                         # (N, HD)
        o_heads.append(o_h * pl.reciprocal(denom, approx=True))

    # ---- lane-pack heads and do ONE output projection matmul ----
    o = jnp.concatenate(o_heads, axis=-1).astype(jnp.bfloat16)                    # (N, D)
    attn = jnp.dot(o, wo_ref[...], preferred_element_type=jnp.float32) + b_o      # (N, D)

    # ---- residual 1 (module applies NO norm here), FFN, residual 2, norm2 ----
    x = src + attn
    h1 = jnp.maximum(jnp.dot(x.astype(jnp.bfloat16), w1_ref[...],
                             preferred_element_type=jnp.float32) + b1, 0.0)       # (N, F)
    x = x + jnp.dot(h1.astype(jnp.bfloat16), w2_ref[...],
                    preferred_element_type=jnp.float32) + b2                      # (N, D)

    mu = jnp.mean(x, axis=-1, keepdims=True)
    var = jnp.mean(jnp.square(x - mu), axis=-1, keepdims=True)
    out_ref[...] = (x - mu) * jax.lax.rsqrt(var + LN_EPS) * ln_w + ln_b


# --------------------------------------------------------------------------- wrapper
@jax.jit
def encoder_layer_forward(src, pos, packed):
    """src/pos in PyTorch layout (S, B, D); returns (S, B, D)."""
    S, B, D = src.shape
    N = S * B
    # contiguous reshapes only (bitcasts) -- no transposes, no mask construction here
    src_f = src.reshape(N, D)
    pos_f = pos.reshape(N, D)

    out_f = pl.pallas_call(
        functools.partial(encoder_layer_kernel, batch=B),
        out_shape=jax.ShapeDtypeStruct((N, D), jnp.float32),
    )(src_f, pos_f, *packed)

    return out_f.reshape(S, B, D)


# ------------------------------------------------------------------- parameter prep
def init_params(key):
    """PyTorch-layout parameters for the module (eval mode)."""
    D, F = D_MODEL, DIM_FF
    ks = jax.random.split(key, 10)
    w = lambda k, shape, s: s * jax.random.normal(k, shape, jnp.float32)
    return {
        "in_proj_weight": w(ks[0], (3 * D, D), 0.1),
        "in_proj_bias": w(ks[1], (3 * D,), 0.05),
        "out_proj_weight": w(ks[2], (D, D), 0.1),
        "out_proj_bias": w(ks[3], (D,), 0.05),
        "w1": w(ks[4], (F, D), 0.1), "b1": w(ks[5], (F,), 0.05),
        "w2": w(ks[6], (D, F), 0.1), "b2": w(ks[7], (D,), 0.05),
        # norm1 is defined by the module but NEVER used in forward (module quirk)
        "n1_w": jnp.ones((D,), jnp.float32), "n1_b": jnp.zeros((D,), jnp.float32),
        "n2_w": 1.0 + w(ks[8], (D,), 0.1), "n2_b": w(ks[9], (D,), 0.05),
    }


def pack_params(p):
    """Host-side packing: pre-transpose, fold softmax scale, bf16 weight slabs."""
    D, F, HD = D_MODEL, DIM_FF, HEAD_DIM
    scale = 1.0 / math.sqrt(HD)

    wq = p["in_proj_weight"][0:D].T * scale                    # (D, D) scaled
    wk = p["in_proj_weight"][D:2 * D].T                        # (D, D)
    wv = p["in_proj_weight"][2 * D:3 * D].T                    # (D, D)
    w_qk = jnp.concatenate([wq, wk], axis=1).astype(jnp.bfloat16)   # (D, 2D)
    w_v = wv.astype(jnp.bfloat16)                                    # (D, D)
    w_o = p["out_proj_weight"].T.astype(jnp.bfloat16)                # (D, D)  = Wo^T
    w_1 = p["w1"].T.astype(jnp.bfloat16)                             # (D, F)
    w_2 = p["w2"].T.astype(jnp.bfloat16)                             # (F, D)

    bq = p["in_proj_bias"][0:D] * scale
    bk = p["in_proj_bias"][D:2 * D]
    bv = p["in_proj_bias"][2 * D:3 * D]

    W = max(2 * D, F)
    vec = jnp.zeros((8, W), jnp.float32)
    vec = vec.at[0, 0:2 * D].set(jnp.concatenate([bq, bk]))
    vec = vec.at[1, 0:F].set(p["b1"])
    vec = vec.at[2, 0:D].set(bv)
    vec = vec.at[3, 0:D].set(p["out_proj_bias"])
    vec = vec.at[4, 0:D].set(p["b2"])
    vec = vec.at[5, 0:D].set(p["n2_w"])
    vec = vec.at[6, 0:D].set(p["n2_b"])
    return (w_qk, w_v, w_o, w_1, w_2, vec)


# --------------------------------------------------------------- pure-JAX reference
def reference_forward(src, pos, p):
    """Direct transliteration of the PyTorch module forward (eval mode)."""
    S, B, D = src.shape
    H, HD = NHEAD, HEAD_DIM
    hi = jax.lax.Precision.HIGHEST

    qk_in = src + pos
    w_in, b_in = p["in_proj_weight"], p["in_proj_bias"]
    q = jnp.einsum("sbd,ed->sbe", qk_in, w_in[0:D], precision=hi) + b_in[0:D]
    k = jnp.einsum("sbd,ed->sbe", qk_in, w_in[D:2 * D], precision=hi) + b_in[D:2 * D]
    v = jnp.einsum("sbd,ed->sbe", src, w_in[2 * D:3 * D], precision=hi) + b_in[2 * D:3 * D]

    split = lambda t: jnp.transpose(t.reshape(S, B * H, HD), (1, 0, 2))   # (B*H, S, HD)
    qh = split(q) * (1.0 / math.sqrt(HD))
    kh, vh = split(k), split(v)
    scores = jnp.einsum("nqd,nkd->nqk", qh, kh, precision=hi)
    probs = jax.nn.softmax(scores, axis=-1)
    o = jnp.einsum("nqk,nkd->nqd", probs, vh, precision=hi)
    o = jnp.transpose(o, (1, 0, 2)).reshape(S, B, D)
    attn = jnp.einsum("sbd,ed->sbe", o, p["out_proj_weight"], precision=hi) + p["out_proj_bias"]

    x = src + attn                                            # no norm1 in the reference
    h1 = jax.nn.relu(jnp.einsum("sbd,fd->sbf", x, p["w1"], precision=hi) + p["b1"])
    x = x + jnp.einsum("sbf,df->sbd", h1, p["w2"], precision=hi) + p["b2"]
    mu = jnp.mean(x, -1, keepdims=True)
    var = jnp.mean(jnp.square(x - mu), -1, keepdims=True)
    return (x - mu) / jnp.sqrt(var + LN_EPS) * p["n2_w"] + p["n2_b"]


# ------------------------------------------------------------------------------ main
if __name__ == "__main__":
    S, B = 8, 2
    key = jax.random.PRNGKey(0)
    k_src, k_pos, k_par = jax.random.split(key, 3)
    src = jax.random.normal(k_src, (S, B, D_MODEL), jnp.float32)
    pos = jax.random.normal(k_pos, (S, B, D_MODEL), jnp.float32)
    params = init_params(k_par)
    packed = pack_params(params)

    out = encoder_layer_forward(src, pos, packed)
    out = jax.block_until_ready(out)

    assert out.shape == (S, B, D_MODEL), out.shape
    assert bool(jnp.all(jnp.isfinite(out)))

    ref = reference_forward(src, pos, params)
    max_err = float(jnp.max(jnp.abs(out - ref)))
    # bf16 MXU operands with f32 accumulation; softmax/LN/residuals in f32
    assert max_err < 2.5e-2, f"max abs err vs reference = {max_err}"

    print("KERNEL_OK")
</pallas_src>

<mosaic_0001>
module attributes {stable_mosaic.version = 11 : i64} {
  func.func @encoder_layer_kernel(%arg0: memref<16x32xf32, #tpu.memory_space<vmem>>, %arg1: memref<16x32xf32, #tpu.memory_space<vmem>>, %arg2: memref<32x64xbf16, #tpu.memory_space<vmem>>, %arg3: memref<32x32xbf16, #tpu.memory_space<vmem>>, %arg4: memref<32x32xbf16, #tpu.memory_space<vmem>>, %arg5: memref<32x64xbf16, #tpu.memory_space<vmem>>, %arg6: memref<64x32xbf16, #tpu.memory_space<vmem>>, %arg7: memref<8x64xf32, #tpu.memory_space<vmem>>, %arg8: memref<16x32xf32, #tpu.memory_space<vmem>>) attributes {dimension_semantics = [], scalar_prefetch = 0 : i64, scratch_operands = 0 : i64, tpu.core_type = #tpu.core_type<tc>} {
    %c0 = arith.constant 0 : index
    %c0_0 = arith.constant 0 : index
    %0 = vector.load %arg0[%c0, %c0_0] : memref<16x32xf32, #tpu.memory_space<vmem>>, vector<16x32xf32>
    %c0_1 = arith.constant 0 : index
    %c0_2 = arith.constant 0 : index
    %1 = vector.load %arg1[%c0_1, %c0_2] : memref<16x32xf32, #tpu.memory_space<vmem>>, vector<16x32xf32>
    %c0_3 = arith.constant 0 : index
    %c0_4 = arith.constant 0 : index
    %2 = vector.load %arg7[%c0_3, %c0_4] : memref<8x64xf32, #tpu.memory_space<vmem>>, vector<8x64xf32>
    %3 = vector.extract_strided_slice %2 {offsets = [0, 0], sizes = [1, 64], strides = [1, 1]} : vector<8x64xf32> to vector<1x64xf32>
    %4 = vector.extract_strided_slice %2 {offsets = [1, 0], sizes = [1, 64], strides = [1, 1]} : vector<8x64xf32> to vector<1x64xf32>
    %5 = vector.extract_strided_slice %2 {offsets = [2, 0], sizes = [1, 32], strides = [1, 1]} : vector<8x64xf32> to vector<1x32xf32>
    %6 = vector.extract_strided_slice %2 {offsets = [3, 0], sizes = [1, 32], strides = [1, 1]} : vector<8x64xf32> to vector<1x32xf32>
    %7 = vector.extract_strided_slice %2 {offsets = [4, 0], sizes = [1, 32], strides = [1, 1]} : vector<8x64xf32> to vector<1x32xf32>
    %8 = vector.extract_strided_slice %2 {offsets = [5, 0], sizes = [1, 32], strides = [1, 1]} : vector<8x64xf32> to vector<1x32xf32>
    %9 = vector.extract_strided_slice %2 {offsets = [6, 0], sizes = [1, 32], strides = [1, 1]} : vector<8x64xf32> to vector<1x32xf32>
    %10 = arith.addf %0, %1 : vector<16x32xf32>
    %11 = arith.truncf %10 : vector<16x32xf32> to vector<16x32xbf16>
    %c0_5 = arith.constant 0 : index
    %c0_6 = arith.constant 0 : index
    %12 = vector.load %arg2[%c0_5, %c0_6] : memref<32x64xbf16, #tpu.memory_space<vmem>>, vector<32x64xbf16>
    %cst = arith.constant dense<0.000000e+00> : vector<16x64xf32>
    %13 = tpu.matmul %11, %12, %cst {dimension_numbers = #tpu.dot_dimension_numbers<[1], [0], [0], [1], [0, 0, 1, 1], [], []>} : vector<16x32xbf16>, vector<32x64xbf16>, vector<16x64xf32> -> vector<16x64xf32>
    %14 = vector.broadcast %3 : vector<1x64xf32> to vector<16x64xf32>
    %15 = arith.addf %13, %14 : vector<16x64xf32>
    %16 = arith.truncf %0 : vector<16x32xf32> to vector<16x32xbf16>
    %c0_7 = arith.constant 0 : index
    %c0_8 = arith.constant 0 : index
    %17 = vector.load %arg3[%c0_7, %c0_8] : memref<32x32xbf16, #tpu.memory_space<vmem>>, vector<32x32xbf16>
    %cst_9 = arith.constant dense<0.000000e+00> : vector<16x32xf32>
    %18 = tpu.matmul %16, %17, %cst_9 {dimension_numbers = #tpu.dot_dimension_numbers<[1], [0], [0], [1], [0, 0, 1, 1], [], []>} : vector<16x32xbf16>, vector<32x32xbf16>, vector<16x32xf32> -> vector<16x32xf32>
    %19 = vector.broadcast %5 : vector<1x32xf32> to vector<16x32xf32>
    %20 = arith.addf %18, %19 : vector<16x32xf32>
    %21 = tpu.iota {dimensions = array<i32: 0>} : vector<16x16xi32>
    %22 = tpu.iota {dimensions = array<i32: 1>} : vector<16x16xi32>
    %c2_i32 = arith.constant 2 : i32
    %c0_i32 = arith.constant 0 : i32
    %23 = arith.cmpi eq, %c2_i32, %c0_i32 : i32
    %c1_i32 = arith.constant 1 : i32
    %24 = arith.select %23, %c1_i32, %c2_i32 : i32
    %25 = vector.broadcast %24 : i32 to vector<16x16xi32>
    %26 = arith.remsi %21, %25 : vector<16x16xi32>
    %c0_i32_10 = arith.constant 0 : i32
    %27 = vector.broadcast %c0_i32_10 : i32 to vector<16x16xi32>
    %28 = arith.cmpi ne, %26, %27 : vector<16x16xi32>
    %c0_i32_11 = arith.constant 0 : i32
    %29 = vector.broadcast %c0_i32_11 : i32 to vector<16x16xi32>
    %30 = arith.cmpi slt, %26, %29 : vector<16x16xi32>
    %c0_i32_12 = arith.constant 0 : i32
    %31 = arith.cmpi slt, %24, %c0_i32_12 : i32
    %32 = vector.broadcast %31 : i1 to vector<16x16xi1>
    %33 = vector.broadcast %32 : vector<16x16xi1> to vector<16x16xi1>
    %34 = arith.xori %30, %33 : vector<16x16xi1>
    %35 = arith.andi %34, %28 : vector<16x16xi1>
    %36 = vector.broadcast %24 : i32 to vector<16x16xi32>
    %37 = arith.addi %26, %36 : vector<16x16xi32>
    %38 = arith.select %35, %37, %26 : vector<16x16xi1>, vector<16x16xi32>
    %c2_i32_13 = arith.constant 2 : i32
    %c0_i32_14 = arith.constant 0 : i32
    %39 = arith.cmpi eq, %c2_i32_13, %c0_i32_14 : i32
    %c1_i32_15 = arith.constant 1 : i32
    %40 = arith.select %39, %c1_i32_15, %c2_i32_13 : i32
    %41 = vector.broadcast %40 : i32 to vector<16x16xi32>
    %42 = arith.remsi %22, %41 : vector<16x16xi32>
    %c0_i32_16 = arith.constant 0 : i32
    %43 = vector.broadcast %c0_i32_16 : i32 to vector<16x16xi32>
    %44 = arith.cmpi ne, %42, %43 : vector<16x16xi32>
    %c0_i32_17 = arith.constant 0 : i32
    %45 = vector.broadcast %c0_i32_17 : i32 to vector<16x16xi32>
    %46 = arith.cmpi slt, %42, %45 : vector<16x16xi32>
    %c0_i32_18 = arith.constant 0 : i32
    %47 = arith.cmpi slt, %40, %c0_i32_18 : i32
    %48 = vector.broadcast %47 : i1 to vector<16x16xi1>
    %49 = vector.broadcast %48 : vector<16x16xi1> to vector<16x16xi1>
    %50 = arith.xori %46, %49 : vector<16x16xi1>
    %51 = arith.andi %50, %44 : vector<16x16xi1>
    %52 = vector.broadcast %40 : i32 to vector<16x16xi32>
    %53 = arith.addi %42, %52 : vector<16x16xi32>
    %54 = arith.select %51, %53, %42 : vector<16x16xi1>, vector<16x16xi32>
    %55 = arith.cmpi eq, %38, %54 : vector<16x16xi32>
    %cst_19 = arith.constant 0.000000e+00 : f32
    %cst_20 = arith.constant -1.000000e+30 : f32
    %56 = vector.broadcast %cst_19 : f32 to vector<16x16xf32>
    %57 = vector.broadcast %cst_20 : f32 to vector<16x16xf32>
    %58 = arith.select %55, %56, %57 : vector<16x16xi1>, vector<16x16xf32>
    %59 = arith.truncf %15 : vector<16x64xf32> to vector<16x64xbf16>
    %60 = arith.truncf %20 : vector<16x32xf32> to vector<16x32xbf16>
    %61 = vector.extract_strided_slice %59 {offsets = [0, 0], sizes = [16, 8], strides = [1, 1]} : vector<16x64xbf16> to vector<16x8xbf16>
    %62 = vector.extract_strided_slice %59 {offsets = [0, 32], sizes = [16, 8], strides = [1, 1]} : vector<16x64xbf16> to vector<16x8xbf16>
    %63 = vector.extract_strided_slice %60 {offsets = [0, 0], sizes = [16, 8], strides = [1, 1]} : vector<16x32xbf16> to vector<16x8xbf16>
    %cst_21 = arith.constant dense<0.000000e+00> : vector<16x16xf32>
    %64 = tpu.matmul %61, %62, %cst_21 {dimension_numbers = #tpu.dot_dimension_numbers<[1], [1], [0], [0], [0, 0, 1, 0], [], []>} : vector<16x8xbf16>, vector<16x8xbf16>, vector<16x16xf32> -> vector<16x16xf32>
    %65 = arith.addf %64, %58 : vector<16x16xf32>
    %cst_22 = arith.constant dense<0xFF800000> : vector<16xf32>
    %66 = vector.multi_reduction <maximumf>, %65, %cst_22 [1] : vector<16x16xf32> to vector<16xf32>
    %67 = vector.shape_cast %66 : vector<16xf32> to vector<16x1xf32>
    %68 = vector.broadcast %67 : vector<16x1xf32> to vector<16x16xf32>
    %69 = arith.subf %65, %68 : vector<16x16xf32>
    %70 = math.exp %69 : vector<16x16xf32>
    %cst_23 = arith.constant dense<0.000000e+00> : vector<16xf32>
    %71 = vector.multi_reduction <add>, %70, %cst_23 [1] : vector<16x16xf32> to vector<16xf32>
    %72 = vector.shape_cast %71 : vector<16xf32> to vector<16x1xf32>
    %73 = arith.truncf %70 : vector<16x16xf32> to vector<16x16xbf16>
    %cst_24 = arith.constant dense<0.000000e+00> : vector<16x8xf32>
    %74 = tpu.matmul %73, %63, %cst_24 {dimension_numbers = #tpu.dot_dimension_numbers<[1], [0], [0], [1], [0, 0, 1, 1], [], []>} : vector<16x16xbf16>, vector<16x8xbf16>, vector<16x8xf32> -> vector<16x8xf32>
    %75 = tpu.reciprocal %72 {approx = true} : vector<16x1xf32> -> vector<16x1xf32>
    %76 = vector.broadcast %75 : vector<16x1xf32> to vector<16x8xf32>
    %77 = arith.mulf %74, %76 : vector<16x8xf32>
    %78 = vector.extract_strided_slice %59 {offsets = [0, 8], sizes = [16, 8], strides = [1, 1]} : vector<16x64xbf16> to vector<16x8xbf16>
    %79 = vector.extract_strided_slice %59 {offsets = [0, 40], sizes = [16, 8], strides = [1, 1]} : vector<16x64xbf16> to vector<16x8xbf16>
    %80 = vector.extract_strided_slice %60 {offsets = [0, 8], sizes = [16, 8], strides = [1, 1]} : vector<16x32xbf16> to vector<16x8xbf16>
    %cst_25 = arith.constant dense<0.000000e+00> : vector<16x16xf32>
    %81 = tpu.matmul %78, %79, %cst_25 {dimension_numbers = #tpu.dot_dimension_numbers<[1], [1], [0], [0], [0, 0, 1, 0], [], []>} : vector<16x8xbf16>, vector<16x8xbf16>, vector<16x16xf32> -> vector<16x16xf32>
    %82 = arith.addf %81, %58 : vector<16x16xf32>
    %cst_26 = arith.constant dense<0xFF800000> : vector<16xf32>
    %83 = vector.multi_reduction <maximumf>, %82, %cst_26 [1] : vector<16x16xf32> to vector<16xf32>
    %84 = vector.shape_cast %83 : vector<16xf32> to vector<16x1xf32>
    %85 = vector.broadcast %84 : vector<16x1xf32> to vector<16x16xf32>
    %86 = arith.subf %82, %85 : vector<16x16xf32>
    %87 = math.exp %86 : vector<16x16xf32>
    %cst_27 = arith.constant dense<0.000000e+00> : vector<16xf32>
    %88 = vector.multi_reduction <add>, %87, %cst_27 [1] : vector<16x16xf32> to vector<16xf32>
    %89 = vector.shape_cast %88 : vector<16xf32> to vector<16x1xf32>
    %90 = arith.truncf %87 : vector<16x16xf32> to vector<16x16xbf16>
    %cst_28 = arith.constant dense<0.000000e+00> : vector<16x8xf32>
    %91 = tpu.matmul %90, %80, %cst_28 {dimension_numbers = #tpu.dot_dimension_numbers<[1], [0], [0], [1], [0, 0, 1, 1], [], []>} : vector<16x16xbf16>, vector<16x8xbf16>, vector<16x8xf32> -> vector<16x8xf32>
    %92 = tpu.reciprocal %89 {approx = true} : vector<16x1xf32> -> vector<16x1xf32>
    %93 = vector.broadcast %92 : vector<16x1xf32> to vector<16x8xf32>
    %94 = arith.mulf %91, %93 : vector<16x8xf32>
    %95 = vector.extract_strided_slice %59 {offsets = [0, 16], sizes = [16, 8], strides = [1, 1]} : vector<16x64xbf16> to vector<16x8xbf16>
    %96 = vector.extract_strided_slice %59 {offsets = [0, 48], sizes = [16, 8], strides = [1, 1]} : vector<16x64xbf16> to vector<16x8xbf16>
    %97 = vector.extract_strided_slice %60 {offsets = [0, 16], sizes = [16, 8], strides = [1, 1]} : vector<16x32xbf16> to vector<16x8xbf16>
    %cst_29 = arith.constant dense<0.000000e+00> : vector<16x16xf32>
    %98 = tpu.matmul %95, %96, %cst_29 {dimension_numbers = #tpu.dot_dimension_numbers<[1], [1], [0], [0], [0, 0, 1, 0], [], []>} : vector<16x8xbf16>, vector<16x8xbf16>, vector<16x16xf32> -> vector<16x16xf32>
    %99 = arith.addf %98, %58 : vector<16x16xf32>
    %cst_30 = arith.constant dense<0xFF800000> : vector<16xf32>
    %100 = vector.multi_reduction <maximumf>, %99, %cst_30 [1] : vector<16x16xf32> to vector<16xf32>
    %101 = vector.shape_cast %100 : vector<16xf32> to vector<16x1xf32>
    %102 = vector.broadcast %101 : vector<16x1xf32> to vector<16x16xf32>
    %103 = arith.subf %99, %102 : vector<16x16xf32>
    %104 = math.exp %103 : vector<16x16xf32>
    %cst_31 = arith.constant dense<0.000000e+00> : vector<16xf32>
    %105 = vector.multi_reduction <add>, %104, %cst_31 [1] : vector<16x16xf32> to vector<16xf32>
    %106 = vector.shape_cast %105 : vector<16xf32> to vector<16x1xf32>
    %107 = arith.truncf %104 : vector<16x16xf32> to vector<16x16xbf16>
    %cst_32 = arith.constant dense<0.000000e+00> : vector<16x8xf32>
    %108 = tpu.matmul %107, %97, %cst_32 {dimension_numbers = #tpu.dot_dimension_numbers<[1], [0], [0], [1], [0, 0, 1, 1], [], []>} : vector<16x16xbf16>, vector<16x8xbf16>, vector<16x8xf32> -> vector<16x8xf32>
    %109 = tpu.reciprocal %106 {approx = true} : vector<16x1xf32> -> vector<16x1xf32>
    %110 = vector.broadcast %109 : vector<16x1xf32> to vector<16x8xf32>
    %111 = arith.mulf %108, %110 : vector<16x8xf32>
    %112 = vector.extract_strided_slice %59 {offsets = [0, 24], sizes = [16, 8], strides = [1, 1]} : vector<16x64xbf16> to vector<16x8xbf16>
    %113 = vector.extract_strided_slice %59 {offsets = [0, 56], sizes = [16, 8], strides = [1, 1]} : vector<16x64xbf16> to vector<16x8xbf16>
    %114 = vector.extract_strided_slice %60 {offsets = [0, 24], sizes = [16, 8], strides = [1, 1]} : vector<16x32xbf16> to vector<16x8xbf16>
    %cst_33 = arith.constant dense<0.000000e+00> : vector<16x16xf32>
    %115 = tpu.matmul %112, %113, %cst_33 {dimension_numbers = #tpu.dot_dimension_numbers<[1], [1], [0], [0], [0, 0, 1, 0], [], []>} : vector<16x8xbf16>, vector<16x8xbf16>, vector<16x16xf32> -> vector<16x16xf32>
    %116 = arith.addf %115, %58 : vector<16x16xf32>
    %cst_34 = arith.constant dense<0xFF800000> : vector<16xf32>
    %117 = vector.multi_reduction <maximumf>, %116, %cst_34 [1] : vector<16x16xf32> to vector<16xf32>
    %118 = vector.shape_cast %117 : vector<16xf32> to vector<16x1xf32>
    %119 = vector.broadcast %118 : vector<16x1xf32> to vector<16x16xf32>
    %120 = arith.subf %116, %119 : vector<16x16xf32>
    %121 = math.exp %120 : vector<16x16xf32>
    %cst_35 = arith.constant dense<0.000000e+00> : vector<16xf32>
    %122 = vector.multi_reduction <add>, %121, %cst_35 [1] : vector<16x16xf32> to vector<16xf32>
    %123 = vector.shape_cast %122 : vector<16xf32> to vector<16x1xf32>
    %124 = arith.truncf %121 : vector<16x16xf32> to vector<16x16xbf16>
    %cst_36 = arith.constant dense<0.000000e+00> : vector<16x8xf32>
    %125 = tpu.matmul %124, %114, %cst_36 {dimension_numbers = #tpu.dot_dimension_numbers<[1], [0], [0], [1], [0, 0, 1, 1], [], []>} : vector<16x16xbf16>, vector<16x8xbf16>, vector<16x8xf32> -> vector<16x8xf32>
    %126 = tpu.reciprocal %123 {approx = true} : vector<16x1xf32> -> vector<16x1xf32>
    %127 = vector.broadcast %126 : vector<16x1xf32> to vector<16x8xf32>
    %128 = arith.mulf %125, %127 : vector<16x8xf32>
    %129 = tpu.concatenate %77, %94, %111, %128 in 1 : vector<16x8xf32>, vector<16x8xf32>, vector<16x8xf32>, vector<16x8xf32> -> vector<16x32xf32>
    %130 = arith.truncf %129 : vector<16x32xf32> to vector<16x32xbf16>
    %c0_37 = arith.constant 0 : index
    %c0_38 = arith.constant 0 : index
    %131 = vector.load %arg4[%c0_37, %c0_38] : memref<32x32xbf16, #tpu.memory_space<vmem>>, vector<32x32xbf16>
    %cst_39 = arith.constant dense<0.000000e+00> : vector<16x32xf32>
    %132 = tpu.matmul %130, %131, %cst_39 {dimension_numbers = #tpu.dot_dimension_numbers<[1], [0], [0], [1], [0, 0, 1, 1], [], []>} : vector<16x32xbf16>, vector<32x32xbf16>, vector<16x32xf32> -> vector<16x32xf32>
    %133 = vector.broadcast %6 : vector<1x32xf32> to vector<16x32xf32>
    %134 = arith.addf %132, %133 : vector<16x32xf32>
    %135 = arith.addf %0, %134 : vector<16x32xf32>
    %136 = arith.truncf %135 : vector<16x32xf32> to vector<16x32xbf16>
    %c0_40 = arith.constant 0 : index
    %c0_41 = arith.constant 0 : index
    %137 = vector.load %arg5[%c0_40, %c0_41] : memref<32x64xbf16, #tpu.memory_space<vmem>>, vector<32x64xbf16>
    %cst_42 = arith.constant dense<0.000000e+00> : vector<16x64xf32>
    %138 = tpu.matmul %136, %137, %cst_42 {dimension_numbers = #tpu.dot_dimension_numbers<[1], [0], [0], [1], [0, 0, 1, 1], [], []>} : vector<16x32xbf16>, vector<32x64xbf16>, vector<16x64xf32> -> vector<16x64xf32>
    %139 = vector.broadcast %4 : vector<1x64xf32> to vector<16x64xf32>
    %140 = arith.addf %138, %139 : vector<16x64xf32>
    %cst_43 = arith.constant 0.000000e+00 : f32
    %141 = vector.broadcast %cst_43 : f32 to vector<16x64xf32>
    %142 = arith.maximumf %140, %141 : vector<16x64xf32>
    %143 = arith.truncf %142 : vector<16x64xf32> to vector<16x64xbf16>
    %c0_44 = arith.constant 0 : index
    %c0_45 = arith.constant 0 : index
    %144 = vector.load %arg6[%c0_44, %c0_45] : memref<64x32xbf16, #tpu.memory_space<vmem>>, vector<64x32xbf16>
    %cst_46 = arith.constant dense<0.000000e+00> : vector<16x32xf32>
    %145 = tpu.matmul %143, %144, %cst_46 {dimension_numbers = #tpu.dot_dimension_numbers<[1], [0], [0], [1], [0, 0, 1, 1], [], []>} : vector<16x64xbf16>, vector<64x32xbf16>, vector<16x32xf32> -> vector<16x32xf32>
    %146 = arith.addf %135, %145 : vector<16x32xf32>
    %147 = vector.broadcast %7 : vector<1x32xf32> to vector<16x32xf32>
    %148 = arith.addf %146, %147 : vector<16x32xf32>
    %cst_47 = arith.constant dense<0.000000e+00> : vector<16xf32>
    %149 = vector.multi_reduction <add>, %148, %cst_47 [1] : vector<16x32xf32> to vector<16xf32>
    %150 = vector.shape_cast %149 : vector<16xf32> to vector<16x1xf32>
    %cst_48 = arith.constant 3.200000e+01 : f32
    %151 = vector.broadcast %cst_48 : f32 to vector<16x1xf32>
    %152 = arith.divf %150, %151 : vector<16x1xf32>
    %153 = vector.broadcast %152 : vector<16x1xf32> to vector<16x32xf32>
    %154 = arith.subf %148, %153 : vector<16x32xf32>
    %155 = arith.mulf %154, %154 : vector<16x32xf32>
    %cst_49 = arith.constant dense<0.000000e+00> : vector<16xf32>
    %156 = vector.multi_reduction <add>, %155, %cst_49 [1] : vector<16x32xf32> to vector<16xf32>
    %157 = vector.shape_cast %156 : vector<16xf32> to vector<16x1xf32>
    %cst_50 = arith.constant 3.200000e+01 : f32
    %158 = vector.broadcast %cst_50 : f32 to vector<16x1xf32>
    %159 = arith.divf %157, %158 : vector<16x1xf32>
    %160 = vector.broadcast %152 : vector<16x1xf32> to vector<16x32xf32>
    %161 = arith.subf %148, %160 : vector<16x32xf32>
    %cst_51 = arith.constant 9.99999974E-6 : f32
    %162 = vector.broadcast %cst_51 : f32 to vector<16x1xf32>
    %163 = arith.addf %159, %162 : vector<16x1xf32>
    %164 = math.rsqrt %163 : vector<16x1xf32>
    %165 = vector.broadcast %164 : vector<16x1xf32> to vector<16x32xf32>
    %166 = arith.mulf %161, %165 : vector<16x32xf32>
    %167 = vector.broadcast %8 : vector<1x32xf32> to vector<16x32xf32>
    %168 = arith.mulf %166, %167 : vector<16x32xf32>
    %169 = vector.broadcast %9 : vector<1x32xf32> to vector<16x32xf32>
    %170 = arith.addf %168, %169 : vector<16x32xf32>
    %c0_52 = arith.constant 0 : index
    %c0_53 = arith.constant 0 : index
    %171 = vector.load %arg8[%c0_52, %c0_53] : memref<16x32xf32, #tpu.memory_space<vmem>>, vector<16x32xf32>
    tpu.vector_store %arg8[%c0_52, %c0_53], %170 {strides = array<i32>} : memref<16x32xf32, #tpu.memory_space<vmem>>, vector<16x32xf32>,
    return
  }
}

</mosaic_0001>

<bundles_post_ra>
// kernel: encoder_layer_forward.1
= control target key start
LH: loop header
LB: loop body
LE: loop exit
PB: predicated region body
PF: predicated region fallthrough
CT: control target
= control target key end

     0   :  { %13 = vsyncpa [#allocation3], 0  ;;  %s1611_s0 = inlined_call_operand.vmem [shape: f32[16,32], index: 0, kind: input, shape index: {}]   ;;  %s1612_s1 = inlined_call_operand.vmem [shape: f32[16,32], index: 1, kind: input, shape index: {}]   ;;  %s1613_s2 = inlined_call_operand.vmem [shape: bf16[32,64], index: 2, kind: input, shape index: {}]   ;;  %s1614_s3 = inlined_call_operand.hbm [shape: bf16[32,32], index: 3, kind: input, shape index: {}]   ;;  %s1615_s4 = inlined_call_operand.hbm [shape: bf16[32,32], index: 4, kind: input, shape index: {}]   ;;  %s1616_s5 = inlined_call_operand.hbm [shape: bf16[32,64], index: 5, kind: input, shape index: {}]   ;;  %s1617_s6 = inlined_call_operand.vmem [shape: bf16[64,32], index: 6, kind: input, shape index: {}]   ;;  %s1618_s7 = inlined_call_operand.vmem [shape: f32[8,64], index: 7, kind: input, shape index: {}]   ;;  %s1619_s8 = inlined_call_operand.hbm [shape: f32[16,32], index: 8, kind: output, shape index: {}]  }
   0x1   :  { %14 = vsyncpa [#allocation6], 0 }
   0x2   :  { %15 = vsyncpa [#allocation4], 0  ;;  %s1369_s27 = smov [#allocation5]   ;;  %s1370_s29 = smov [#allocation2]  }
   0x3   :  { %s39_s28 = sshll.u32 %s1369_s27, 4  ;;  %s27_s30 = sshll.u32 %s1370_s29, 4  ;;  %s40_s28 = int_to_ptr.vmem [resolvable:$true] %s39_s28  ;;  %s28_s30 = int_to_ptr.vmem [resolvable:$true] %s27_s30 }
   0x4   :  { %s1291_s9 = scalar_lea.vmem %s40_s28, 256  ;;  %p1296_p1 = scmp.lt.s32.totalorder %s40_s28, %s40_s28 }
   0x5   :  { %p1292_p0 = scmp.ne.s32.totalorder %s40_s28, %s1291_s9  ;;  %p1297_p2 = scmp.lt.s32.totalorder %s1291_s9, %s1291_s9 }
   0x7   :  { %p1298_p3 = por %p1297_p2, %p1296_p1 }
   0x9   :  { %p1299_p4 = pnand %p1298_p3, %p1292_p0 }
   0xb   :  { %1302 = shalt.err (!%p1299_p4)
}
   0xc   :  { %s1371_s10 = smov 64   ;;  %s1372_s11 = smov 4  }
   0xd   :  { %45 = dma.hbm_to_vmem [thread:$0]  %s1615_s4, 256, %s40_s28, [#allocation6], %s1371_s10, %s1371_s10, %s1372_s11  }
   0xe   :  { %s1311_s14 = scalar_lea.vmem %s28_s30, 256  ;;  %p1316_p6 = scmp.lt.s32.totalorder %s28_s30, %s28_s30 }
   0xf   :  { %p1312_p5 = scmp.ne.s32.totalorder %s28_s30, %s1311_s14  ;;  %p1317_p7 = scmp.lt.s32.totalorder %s1311_s14, %s1311_s14 }
  0x11   :  { %p1318_p8 = por %p1317_p7, %p1316_p6 }
  0x13   :  { %p1319_p9 = pnand %p1318_p8, %p1312_p5 }
  0x15   :  { %1322 = shalt.err (!%p1319_p9)
}
  0x16   :  { %33 = dma.hbm_to_vmem [thread:$0]  %s1614_s3, 256, %s28_s30, [#allocation3], %s1371_s10, %s1371_s10, %s1372_s11  }
  0x17   :  { %s1373_s17 = smov [#allocation7]  }
  0x18   :  { %s51_s18 = sshll.u32 %s1373_s17, 4  ;;  %s52_s18 = int_to_ptr.vmem [resolvable:$true] %s51_s18 }
  0x19   :  { %s1331_s19 = scalar_lea.vmem %s52_s18, 256  ;;  %p1336_p11 = scmp.lt.s32.totalorder %s52_s18, %s52_s18 }
  0x1a   :  { %p1332_p10 = scmp.ne.s32.totalorder %s52_s18, %s1331_s19  ;;  %p1337_p12 = scmp.lt.s32.totalorder %s1331_s19, %s1331_s19 }
  0x1c   :  { %p1338_p13 = por %p1337_p12, %p1336_p11 }
  0x1e   :  { %p1339_p0 = pnand %p1338_p13, %p1332_p10 }
  0x20   :  { %1342 = shalt.err (!%p1339_p0)
}
  0x21   :  { %57 = dma.hbm_to_vmem [thread:$0]  %s1616_s5, 256, %s52_s18, [#allocation6], %s1371_s10, %s1371_s10, %s1372_s11  }
  0x22   :  { %1363 = dma.done.wait [#allocation3], 256  }
  0x23   :  { %1364 = vsyncadd [#allocation3], 4294967040 }
  0x24   :  { %1365 = dma.done.wait [#allocation6], 512  }
  0x25   :  { %1366 = vsyncadd [#allocation6], 4294966784  ;;  %v1374_v0 = vmov 0.0   ;;  %vm1375_vm0 = vmmov 0   ;;  %v1235_v1 = vld [vmem:[%s1613_s2 + $0x8] sm:$0xff]   ;;  %v1236_v2 = vld [vmem:[%s1613_s2] sm:$0xff]   ;;  %v84_v10 = vlaneseq }
  0x26   :  { %1108 = vmatprep.subr.bf16.mxu1 %v1374_v0  ;;  %1112 = vmatprep.mubr.msk.bf16.mxu1 %vm1375_vm0, %v1374_v0  ;;  %v1458_v3 = vld [vmem:[%s1611_s0] sm:$0xff]  ;;  %v1463_v4 = vld [vmem:[%s1611_s0 + $0x8] sm:$0xff]  ;;  %vm100_vm1 = vcmask 261120   ;;  %s1376_s2 = smov 120   ;;  %s1377_s9 = smov 96   ;;  %vm260_vm2 = vcmask 64512  }
  0x27   :  { %1124 = vmatprep.subr.bf16.mxu0 %v1374_v0  ;;  %1126 = vmatprep.mubr.msk.bf16.mxu0 %vm1375_vm0, %v1374_v0  ;;  %v74_v5 = vld [vmem:[%s1612_s1] sm:$0xff]  ;;  %v75_v6 = vld [vmem:[%s1612_s1 + $0x8] sm:$0xff]  ;;  %v1479_v11 = vshrl.u32 %v84_v10, 7  ;;  %s1378_s10 = smov 80   ;;  %s1379_s11 = smov 88   ;;  %v145_v24 = vpack.c.bf16 %v1463_v4, %v1458_v3  ;;  %v214_v45 = vand.u32 127, %v84_v10 }
  0x28   :  { %1109 = vmatpush3.bf16.msra.mxu1 %v1235_v1  ;;  %v77_v7 = vadd.f32 %v74_v5, %v1458_v3  ;;  %v78_v8 = vadd.f32 %v75_v6, %v1463_v4  ;;  %v1485_v13 = vld [vmem:[%s1618_s7] sm:$0xff]  ;;  %s1380_s7 = smov 72   ;;  %s1381_s12 = smov 112   ;;  %v1237_v22 = vld [vmem:[#allocation2 + $0x8] sm:$0xff]   ;;  %v1383_v50 = vmov -1e+30  }
  0x29   :  { %1110 = vmatprep.subr.bf16.mxu1 %v1374_v0  ;;  %v86_v12 = vsub.s32 0, %v1479_v11  ;;  %s1382_s13 = smov 104   ;;  %v1238_v23 = vld [vmem:[#allocation2] sm:$0xff]   ;;  %v152_v36 = vsub.s32 2, %v1479_v11  ;;  %v219_v46 = vand.u32 1, %v1479_v11  ;;  %v243_v47 = vand.u32 1, %v214_v45 }
  0x2a   :  { %v79_v9 = vpack.c.bf16 %v78_v8, %v77_v7  ;;  %v212_v48 = vadd.s32 8, %v1479_v11  ;;  %vm308_vm5 = vcmask 130048   ;;  %s1384_s14 = smov 8   ;;  %s1385_s15 = smov 16   ;;  %vm768_vm6 = vcmask 195584  }
  0x2b   :  { %v87_v15 = vrot.slane %v1485_v13, %v86_v12  ;;  %v153_v38 = vrot.slane %v1485_v13, %v152_v36  ;;  %vm251_vm3 = vcmp.eq.s32.totalorder %v219_v46, %v243_v47  ;;  %s1386_s16 = smov 24   ;;  %vm938_vm7 = vcmask 523264  }
  0x2c   :  { %1111 = vmatpush3.bf16.msra.mxu1 %v1236_v2  ;;  %v226_v49 = vand.u32 1, %v212_v48  ;;  %v253_v51 = vsel %vm251_vm3, 0.0, %v1383_v50 }
  0x2d   :  { %1116 = vmatprep.subr.bf16.mxu1 %v1374_v0 }
  0x2e   :  { %vm252_vm4 = vcmp.eq.s32.totalorder %v226_v49, %v243_v47 }
  0x2f   :  { %1113 = vmatmul.mubr.msk.bf16.vlgmr.msra.gmra.mxu1 %vm100_vm1, %v79_v9  ;;  %v254_v55 = vsel %vm252_vm4, 0.0, %v1383_v50 }
  0x30   :  { %1120 = vmatprep.mubr.msk.bf16.mxu1 %vm1375_vm0, %v1374_v0  ;;  %1117 = vmatpush3.bf16.msra.mxu1 %v1237_v22 }
  0x31   :  { %1118 = vmatprep.subr.bf16.mxu1 %v1374_v0 }
  0x34   :  { %1119 = vmatpush3.bf16.msra.mxu1 %v1238_v23 }
  0x35   :  { %1130 = vmatprep.subr.bf16.mxu1 %v1374_v0 }
  0x37   :  { %1121 = vmatmul.mubr.msk.bf16.vlgmr.msra.gmra.mxu1 %vm100_vm1, %v145_v24 }
  0x38   :  { %1132 = vmatprep.mubr.msk.bf16.mxu1 %vm1375_vm0, %v1374_v0 }
  0xef   :  { %v138_v14 = vpop.f32.mrf.mxu1 }
  0xf0   :  { %v139_v18 = vadd.f32 %v138_v14, %v87_v15 }
  0xf1   :  { %v1114_v16 = vpop.f32.mrf.mxu1 }
  0xf3   :  { %v141_v17 = vpop.f32.mrf.mxu1 }
  0xf4   :  { %v142_v19 = vadd.f32 %v141_v17, %v87_v15 }
  0xf5   :  { %v1115_v20 = vpop.f32.mrf.mxu1 }
  0xf6   :  { %v255_v21 = vpack.c.bf16 %v142_v19, %v139_v18 }
  0xf7   :  { %v203_v37 = vpop.f32.mrf.mxu1 }
  0xf8   :  { %376 = vrot.lane.b32.xlu1 %v255_v21, %s1376_s2  ;;  %258 = vrot.lane.b32.xlu0 %v255_v21, %s1377_s9  ;;  %v204_v40 = vadd.f32 %v203_v37, %v153_v38 }
  0xf9   :  { %v1122_v39 = vpop.f32.mrf.mxu1 }
  0xfb   :  { %v206_v41 = vpop.f32.mrf.mxu1 }
  0xfc   :  { %500 = vrot.lane.b32.xlu1 %v255_v21, %s1378_s10  ;;  %378 = vrot.lane.b32.xlu0 %v255_v21, %s1379_s11  ;;  %v207_v42 = vadd.f32 %v206_v41, %v153_v38 }
  0xfd   :  { %v1123_v43 = vpop.f32.mrf.mxu1 }
  0xfe   :  { %v256_v44 = vpack.c.bf16 %v207_v42, %v204_v40 }
 0x100   :  { %621 = vrot.lane.b32.xlu1 %v255_v21, %s1380_s7  ;;  %498 = vrot.lane.b32.xlu0 %v255_v21, %s1381_s12 }
 0x101   :  { %1131 = vmatpush3.bf16.msra.mxu1 %v256_v44 }
 0x102   :  { %1142 = vmatprep.subr.bf16.mxu1 %v1374_v0 }
 0x104   :  { %619 = vrot.lane.b32.xlu0 %v255_v21, %s1382_s13 }
 0x16a   :  { %v259_v25 = vpop.permute.xlu0 %258  ;;  %v377_v28 = vpop.permute.xlu1 %376 }
 0x16b   :  { %v265_v26 = vsel %vm260_vm2, %v259_v25, 0 }
 0x16c   :  { %1125 = vmatpush3.bf16.xpose.msra.mxu0 %v265_v26 }
 0x16d   :  { %1136 = vmatprep.subr.bf16.mxu0 %v1374_v0 }
 0x16e   :  { %v379_v27 = vpop.permute.xlu0 %378  ;;  %v501_v30 = vpop.permute.xlu1 %500 }
 0x16f   :  { %v384_v29 = vsel %vm260_vm2, %v379_v27, 0  ;;  %v506_v31 = vsel %vm260_vm2, %v501_v30, 0 }
 0x172   :  { %v622_v32 = vpop.permute.xlu1 %621  ;;  %v499_v33 = vpop.permute.xlu0 %498 }
 0x173   :  { %1127 = vmatmul.mubr.msk.bf16.vlgmr.msra.gmra.mxu0 %vm260_vm2, %v255_v21  ;;  %v627_v34 = vsel %vm260_vm2, %v622_v32, 0 }
 0x174   :  { %1137 = vmatpush3.bf16.xpose.msra.mxu0 %v384_v29  ;;  %1138 = vmatprep.mubr.msk.bf16.mxu0 %vm1375_vm0, %v1374_v0 }
 0x175   :  { %1148 = vmatprep.subr.bf16.mxu0 %v1374_v0 }
 0x176   :  { %v620_v35 = vpop.permute.xlu0 %619 }
 0x17b   :  { %1139 = vmatmul.mubr.msk.bf16.vlgmr.msra.gmra.mxu0 %vm260_vm2, %v377_v28 }
 0x17c   :  { %1149 = vmatpush3.bf16.xpose.msra.mxu0 %v506_v31  ;;  %1150 = vmatprep.mubr.msk.bf16.mxu0 %vm1375_vm0, %v1374_v0 }
 0x17d   :  { %1160 = vmatprep.subr.bf16.mxu0 %v1374_v0 }
 0x183   :  { %1151 = vmatmul.mubr.msk.bf16.vlgmr.msra.gmra.mxu0 %vm260_vm2, %v499_v33 }
 0x184   :  { %1161 = vmatpush3.bf16.xpose.msra.mxu0 %v627_v34  ;;  %1162 = vmatprep.mubr.msk.bf16.mxu0 %vm1375_vm0, %v1374_v0 }
 0x185   :  { %1172 = vmatprep.subr.bf16.mxu0 %v1374_v0 }
 0x18b   :  { %1163 = vmatmul.mubr.msk.bf16.vlgmr.msra.gmra.mxu0 %vm260_vm2, %v620_v35 }
 0x18c   :  { %1176 = vmatprep.mubr.msk.bf16.mxu0 %vm1375_vm0, %v1374_v0 }
 0x233   :  { %v301_v52 = vpop.f32.mrf.mxu0 }
 0x234   :  { %v302_v53 = vadd.f32 %v301_v52, %v253_v51 }
 0x235   :  { %v1128_v54 = vpop.f32.mrf.mxu0 }
 0x236   :  { %v309_v56 = vsel %vm308_vm5, %v302_v53, -inf }
 0x237   :  { %310 = vmax.xlane.f32.xlu1 %v309_v56  ;;  %v304_v57 = vpop.f32.mrf.mxu0 }
 0x238   :  { %v305_v58 = vadd.f32 %v304_v57, %v254_v55 }
 0x239   :  { %v1129_v59 = vpop.f32.mrf.mxu0 }
 0x23a   :  { %v312_v60 = vsel %vm308_vm5, %v305_v58, -inf }
 0x23b   :  { %313 = vmax.xlane.f32.xlu0 %v312_v60  ;;  %v420_v61 = vpop.f32.mrf.mxu0 }
 0x23c   :  { %v421_v62 = vadd.f32 %v420_v61, %v253_v51 }
 0x23d   :  { %v1140_v63 = vpop.f32.mrf.mxu0 }
 0x23e   :  { %v427_v1 = vsel %vm308_vm5, %v421_v62, -inf }
 0x23f   :  { %428 = vmax.xlane.f32.xlu0 %v427_v1  ;;  %v423_v2 = vpop.f32.mrf.mxu0 }
 0x240   :  { %v424_v5 = vadd.f32 %v423_v2, %v254_v55 }
 0x241   :  { %v1141_v6 = vpop.f32.mrf.mxu0 }
 0x242   :  { %v430_v7 = vsel %vm308_vm5, %v424_v5, -inf }
 0x243   :  { %431 = vmax.xlane.f32.xlu1 %v430_v7  ;;  %v542_v8 = vpop.f32.mrf.mxu0 }
 0x244   :  { %v543_v9 = vadd.f32 %v542_v8, %v253_v51 }
 0x245   :  { %v1152_v10 = vpop.f32.mrf.mxu0 }
 0x246   :  { %v549_v12 = vsel %vm308_vm5, %v543_v9, -inf }
 0x247   :  { %550 = vmax.xlane.f32.xlu0 %v549_v12  ;;  %v545_v14 = vpop.f32.mrf.mxu0 }
 0x248   :  { %v546_v15 = vadd.f32 %v545_v14, %v254_v55 }
 0x249   :  { %v1153_v16 = vpop.f32.mrf.mxu0 }
 0x24a   :  { %v552_v17 = vsel %vm308_vm5, %v546_v15, -inf }
 0x24b   :  { %553 = vmax.xlane.f32.xlu1 %v552_v17  ;;  %v663_v18 = vpop.f32.mrf.mxu0 }
 0x24c   :  { %v664_v19 = vadd.f32 %v663_v18, %v253_v51 }
 0x24d   :  { %v1164_v20 = vpop.f32.mrf.mxu0 }
 0x24e   :  { %v670_v21 = vsel %vm308_vm5, %v664_v19, -inf }
 0x24f   :  { %671 = vmax.xlane.f32.xlu0 %v670_v21  ;;  %v666_v22 = vpop.f32.mrf.mxu0 }
 0x250   :  { %v1533_v24 = vadd.f32 %v666_v22, %v254_v55 }
 0x251   :  { %v1165_v23 = vpop.f32.mrf.mxu0 }
 0x252   :  { %v673_v25 = vsel %vm308_vm5, %v1533_v24, -inf }
 0x25c   :  { %568 = vrot.lane.b32.xlu1 %v256_v44, %s1381_s12 }
 0x265   :  { %447 = vrot.lane.b32.xlu0 %v256_v44, %s1376_s2 }
 0x280   :  { %674 = vmax.xlane.f32.xlu1 %v673_v25 }
 0x291   :  { %689 = vrot.lane.b32.xlu1 %v256_v44, %s1382_s13 }
 0x2c0   :  { %v311_v26 = vpop.xlane.xlu1 %310 }
 0x2c1   :  { %v315_v27 = vsub.f32 %v302_v53, %v311_v26 }
 0x2c3   :  { %v317_v28 = vmul.f32 1.442695, %v315_v27 }
 0x2c4   :  { %v314_v29 = vpop.xlane.xlu0 %313 }
 0x2c5   :  { %v316_v30 = vsub.f32 %v305_v58, %v314_v29  ;;  %1247 = vpow2.f32 %v317_v28 }
 0x2c7   :  { %v319_v31 = vmul.f32 1.442695, %v316_v30  ;;  %v1239_v30 = vld [vmem:[#allocation5 + $0x8] sm:$0xff]  }
 0x2c8   :  { %v429_v32 = vpop.xlane.xlu0 %428  ;;  %1173 = vmatpush3.bf16.msra.mxu0 %v1239_v30  ;;  %v1244_v30 = vld [vmem:[%s1617_s6 + $0x10] sm:$0xff]  }
 0x2c9   :  { %1249 = vpow2.f32 %v319_v31  ;;  %v433_v33 = vsub.f32 %v421_v62, %v429_v32  ;;  %1174 = vmatprep.subr.bf16.mxu0 %v1374_v0 }
 0x2cb   :  { %v435_v34 = vmul.f32 1.442695, %v433_v33 }
 0x2cc   :  { %v432_v35 = vpop.xlane.xlu1 %431 }
 0x2cd   :  { %1251 = vpow2.f32 %v435_v34  ;;  %v434_v36 = vsub.f32 %v424_v5, %v432_v35 }
 0x2cf   :  { %v437_v37 = vmul.f32 1.442695, %v434_v36 }
 0x2d0   :  { %v551_v38 = vpop.xlane.xlu0 %550 }
 0x2d1   :  { %1253 = vpow2.f32 %v437_v37  ;;  %v555_v39 = vsub.f32 %v543_v9, %v551_v38 }
 0x2d2   :  { %v1248_v42 = vpop.eup %1247 }
 0x2d3   :  { %v557_v40 = vmul.f32 1.442695, %v555_v39  ;;  %v321_v1 = vsel %vm308_vm5, %v1248_v42, 0.0 }
 0x2d4   :  { %v554_v41 = vpop.xlane.xlu1 %553 }
 0x2d5   :  { %1255 = vpow2.f32 %v557_v40  ;;  %v556_v43 = vsub.f32 %v546_v15, %v554_v41 }
 0x2d6   :  { %v1250_v44 = vpop.eup %1249 }
 0x2d7   :  { %v559_v45 = vmul.f32 1.442695, %v556_v43  ;;  %v327_v46 = vpack.c.bf16 %v1250_v44, %v1248_v42  ;;  %v324_v12 = vsel %vm308_vm5, %v1250_v44, 0.0  ;;  %v1240_v43 = vld [vmem:[#allocation5] sm:$0xff]  }
 0x2d8   :  { %v672_v47 = vpop.xlane.xlu0 %671  ;;  %v569_v56 = vpop.permute.xlu1 %568  ;;  %1175 = vmatpush3.bf16.msra.mxu0 %v1240_v43 }
 0x2d9   :  { %1257 = vpow2.f32 %v559_v45  ;;  %v676_v48 = vsub.f32 %v664_v19, %v672_v47  ;;  %1133 = vmatmul.mubr.msk.bf16.vlgmr.msra.gmra.mxu1 %vm308_vm5, %v327_v46  ;;  %1188 = vmatprep.subr.bf16.mxu0 %v1374_v0 }
 0x2da   :  { %v1252_v49 = vpop.eup %1251  ;;  %1144 = vmatprep.mubr.msk.bf16.mxu1 %vm1375_vm0, %v1374_v0 }
 0x2db   :  { %v678_v50 = vmul.f32 1.442695, %v676_v48  ;;  %v439_v51 = vsel %vm308_vm5, %v1252_v49, 0.0 }
 0x2dc   :  { %440 = vadd.xlane.f32.xlu0 %v439_v51  ;;  %v448_v52 = vpop.permute.xlu0 %447 }
 0x2dd   :  { %1259 = vpow2.f32 %v678_v50  ;;  %1143 = vmatpush3.bf16.msra.mxu1 %v448_v52 }
 0x2de   :  { %v1254_v53 = vpop.eup %1253  ;;  %1154 = vmatprep.subr.bf16.mxu1 %v1374_v0 }
 0x2df   :  { %v442_v54 = vsel %vm308_vm5, %v1254_v53, 0.0  ;;  %v445_v55 = vpack.c.bf16 %v1254_v53, %v1252_v49 }
 0x2e0   :  { %443 = vadd.xlane.f32.xlu1 %v442_v54 }
 0x2e1   :  { %1145 = vmatmul.mubr.msk.bf16.vlgmr.msra.gmra.mxu1 %vm308_vm5, %v445_v55 }
 0x2e2   :  { %v1256_v57 = vpop.eup %1255  ;;  %1155 = vmatpush3.bf16.msra.mxu1 %v569_v56  ;;  %1156 = vmatprep.mubr.msk.bf16.mxu1 %vm1375_vm0, %v1374_v0 }
 0x2e3   :  { %v561_v58 = vsel %vm308_vm5, %v1256_v57, 0.0  ;;  %1166 = vmatprep.subr.bf16.mxu1 %v1374_v0 }
 0x2e4   :  { %562 = vadd.xlane.f32.xlu0 %v561_v58 }
 0x2e6   :  { %v1258_v59 = vpop.eup %1257 }
 0x2e7   :  { %v564_v60 = vsel %vm308_vm5, %v1258_v59, 0.0  ;;  %v567_v61 = vpack.c.bf16 %v1258_v59, %v1256_v57 }
 0x2e8   :  { %565 = vadd.xlane.f32.xlu0 %v564_v60 }
 0x2e9   :  { %1157 = vmatmul.mubr.msk.bf16.vlgmr.msra.gmra.mxu1 %vm308_vm5, %v567_v61 }
 0x2ea   :  { %v1260_v62 = vpop.eup %1259  ;;  %1168 = vmatprep.mubr.msk.bf16.mxu1 %vm1375_vm0, %v1374_v0 }
 0x2eb   :  { %v682_v63 = vsel %vm308_vm5, %v1260_v62, 0.0 }
 0x2ec   :  { %683 = vadd.xlane.f32.xlu1 %v682_v63 }
 0x2f0   :  { %322 = vadd.xlane.f32.xlu1 %v321_v1 }
 0x309   :  { %v675_v2 = vpop.xlane.xlu1 %674 }
 0x30a   :  { %v677_v5 = vsub.f32 %v1533_v24, %v675_v2 }
 0x30c   :  { %v680_v6 = vmul.f32 1.442695, %v677_v5 }
 0x30d   :  { %v690_v7 = vpop.permute.xlu1 %689 }
 0x30e   :  { %1261 = vpow2.f32 %v680_v6  ;;  %1167 = vmatpush3.bf16.msra.mxu1 %v690_v7 }
 0x30f   :  { %1180 = vmatprep.subr.bf16.mxu1 %v1374_v0 }
 0x31b   :  { %v1262_v8 = vpop.eup %1261 }
 0x31c   :  { %v685_v9 = vsel %vm308_vm5, %v1262_v8, 0.0  ;;  %v688_v10 = vpack.c.bf16 %v1262_v8, %v1260_v62 }
 0x31d   :  { %686 = vadd.xlane.f32.xlu0 %v685_v9 }
 0x31e   :  { %1169 = vmatmul.mubr.msk.bf16.vlgmr.msra.gmra.mxu1 %vm308_vm5, %v688_v10 }
 0x31f   :  { %1184 = vmatprep.mubr.msk.bf16.mxu1 %vm1375_vm0, %v1374_v0 }
 0x321   :  { %325 = vadd.xlane.f32.xlu0 %v324_v12 }
 0x365   :  { %v441_v14 = vpop.xlane.xlu0 %440 }
 0x366   :  { %1263 = vrcp.f32 %v441_v14 }
 0x369   :  { %v444_v15 = vpop.xlane.xlu1 %443 }
 0x36a   :  { %1265 = vrcp.f32 %v444_v15 }
 0x36d   :  { %v563_v16 = vpop.xlane.xlu0 %562 }
 0x36e   :  { %1267 = vrcp.f32 %v563_v16  ;;  %v1241_v16 = vld [vmem:[#allocation7 + $0x8] sm:$0xff]  }
 0x36f   :  { %1181 = vmatpush3.bf16.msra.mxu1 %v1241_v16 }
 0x370   :  { %1182 = vmatprep.subr.bf16.mxu1 %v1374_v0 }
 0x371   :  { %v566_v19 = vpop.xlane.xlu0 %565 }
 0x372   :  { %1269 = vrcp.f32 %v566_v19  ;;  %v778_v19 = vsub.s32 3, %v1479_v11 }
 0x373   :  { %v1264_v24 = vpop.eup %1263 }
 0x375   :  { %v684_v41 = vpop.xlane.xlu1 %683 }
 0x376   :  { %1271 = vrcp.f32 %v684_v41 }
 0x377   :  { %v1266_v25 = vpop.eup %1265 }
 0x379   :  { %v323_v54 = vpop.xlane.xlu1 %322 }
 0x37b   :  { %v1268_v34 = vpop.eup %1267 }
 0x37f   :  { %v1270_v35 = vpop.eup %1269 }
 0x383   :  { %v1272_v46 = vpop.eup %1271 }
 0x399   :  { %v365_v17 = vpop.f32.mrf.mxu1 }
 0x39b   :  { %v1134_v18 = vpop.f32.mrf.mxu1 }
 0x39c   :  { %v1243_v18 = vld [vmem:[%s1617_s6 + $0x18] sm:$0xff]  }
 0x39d   :  { %v368_v20 = vpop.f32.mrf.mxu1 }
 0x39f   :  { %v1135_v21 = vpop.f32.mrf.mxu1 }
 0x3a1   :  { %v487_v22 = vpop.f32.mrf.mxu1 }
 0x3a2   :  { %v496_v27 = vmul.f32 %v1264_v24, %v487_v22 }
 0x3a3   :  { %v1146_v23 = vpop.f32.mrf.mxu1 }
 0x3a5   :  { %v490_v26 = vpop.f32.mrf.mxu1 }
 0x3a6   :  { %v497_v28 = vmul.f32 %v1266_v25, %v490_v26  ;;  %v687_v42 = vpop.xlane.xlu0 %686 }
 0x3a7   :  { %v1147_v29 = vpop.f32.mrf.mxu1  ;;  %1273 = vrcp.f32 %v687_v42 }
 0x3a8   :  { %v1220_v31 = vpack.i.bf16 %v497_v28, %v496_v27 }
 0x3a9   :  { %v608_v32 = vpop.f32.mrf.mxu1 }
 0x3aa   :  { %1221 = vrot.lane.b32.xlu1 %v1220_v31, %s1384_s14  ;;  %v617_v37 = vmul.f32 %v1268_v34, %v608_v32  ;;  %v326_v53 = vpop.xlane.xlu0 %325  ;;  %v1245_v31 = vld [vmem:[%s1617_s6 + $0x8] sm:$0xff]  }
 0x3ab   :  { %v1158_v33 = vpop.f32.mrf.mxu1  ;;  %1275 = vrcp.f32 %v326_v53 }
 0x3ac   :  { %1277 = vrcp.f32 %v323_v54 }
 0x3ad   :  { %v611_v36 = vpop.f32.mrf.mxu1 }
 0x3ae   :  { %v618_v38 = vmul.f32 %v1270_v35, %v611_v36 }
 0x3af   :  { %v1159_v39 = vpop.f32.mrf.mxu1 }
 0x3b0   :  { %v1225_v40 = vpack.i.bf16 %v618_v38, %v617_v37 }
 0x3b2   :  { %1226 = vrot.lane.b32.xlu0 %v1225_v40, %s1385_s15 }
 0x3b4   :  { %v1274_v47 = vpop.eup %1273 }
 0x3b8   :  { %v1276_v57 = vpop.eup %1275 }
 0x3b9   :  { %v1278_v60 = vpop.eup %1277  ;;  %v375_v1 = vmul.f32 %v1276_v57, %v368_v20  ;;  %v779_v20 = vrot.slane %v1485_v13, %v778_v19 }
 0x3ba   :  { %v374_v63 = vmul.f32 %v1278_v60, %v365_v17  ;;  %v1242_v17 = vld [vmem:[#allocation7] sm:$0xff]  }
 0x3bb   :  { %1183 = vmatpush3.bf16.msra.mxu1 %v1242_v17 }
 0x3de   :  { %v729_v44 = vpop.f32.mrf.mxu1 }
 0x3df   :  { %v738_v49 = vmul.f32 %v1272_v46, %v729_v44 }
 0x3e0   :  { %v1170_v45 = vpop.f32.mrf.mxu1 }
 0x3e2   :  { %v732_v48 = vpop.f32.mrf.mxu1 }
 0x3e3   :  { %v739_v50 = vmul.f32 %v1274_v47, %v732_v48 }
 0x3e4   :  { %v1171_v51 = vpop.f32.mrf.mxu1 }
 0x3e5   :  { %v1230_v52 = vpack.i.bf16 %v739_v50, %v738_v49 }
 0x3e7   :  { %1231 = vrot.lane.b32.xlu1 %v1230_v52, %s1386_s16 }
 0x41c   :  { %v1222_v55 = vpop.permute.xlu1 %1221 }
 0x41d   :  { %v1224_v58 = vunpack.i.h.bf16 %v1222_v55  ;;  %v1223_v59 = vunpack.i.l.bf16 %v1222_v55 }
 0x41f   :  { %v765_v5 = vsel %vm260_vm2, %v375_v1, %v1224_v58  ;;  %v764_v6 = vsel %vm260_vm2, %v374_v63, %v1223_v59 }
 0x424   :  { %v1227_v56 = vpop.permute.xlu0 %1226 }
 0x425   :  { %v1229_v61 = vunpack.i.h.bf16 %v1227_v56  ;;  %v1228_v62 = vunpack.i.l.bf16 %v1227_v56 }
 0x427   :  { %v767_v9 = vsel %vm308_vm5, %v765_v5, %v1229_v61  ;;  %v766_v10 = vsel %vm308_vm5, %v764_v6, %v1228_v62 }
 0x459   :  { %v1232_v2 = vpop.permute.xlu1 %1231 }
 0x45a   :  { %v1234_v7 = vunpack.i.h.bf16 %v1232_v2  ;;  %v1233_v8 = vunpack.i.l.bf16 %v1232_v2 }
 0x45c   :  { %v770_v12 = vsel %vm768_vm6, %v767_v9, %v1234_v7  ;;  %v769_v14 = vsel %vm768_vm6, %v766_v10, %v1233_v8  ;;  %v1020_v8 = vsub.s32 5, %v1479_v11  ;;  %v1026_v9 = vsub.s32 6, %v1479_v11 }
 0x45d   :  { %v771_v15 = vpack.c.bf16 %v770_v12, %v769_v14 }
 0x45e   :  { %v1021_v10 = vrot.slane %v1485_v13, %v1020_v8 }
 0x45f   :  { %1177 = vmatmul.mubr.msk.bf16.vlgmr.msra.gmra.mxu0 %vm100_vm1, %v771_v15  ;;  %v1027_v15 = vrot.slane %v1485_v13, %v1026_v9 }
 0x460   :  { %1196 = vmatprep.mubr.msk.bf16.mxu0 %vm1375_vm0, %v1374_v0  ;;  %1189 = vmatpush3.bf16.msra.mxu0 %v1243_v18 }
 0x461   :  { %1190 = vmatprep.subr.bf16.mxu0 %v1374_v0 }
 0x464   :  { %1191 = vmatpush3.bf16.msra.mxu0 %v1244_v30 }
 0x465   :  { %1192 = vmatprep.subr.bf16.mxu0 %v1374_v0 }
 0x468   :  { %1193 = vmatpush3.bf16.msra.mxu0 %v1245_v31 }
 0x469   :  { %1194 = vmatprep.subr.bf16.mxu0 %v1374_v0  ;;  %v987_v0 = vsub.s32 4, %v1479_v11 }
 0x46b   :  { %v988_v42 = vrot.slane %v1485_v13, %v987_v0 }
 0x51f   :  { %v829_v21 = vpop.f32.mrf.mxu0 }
 0x520   :  { %v830_v23 = vadd.f32 %v829_v21, %v779_v20 }
 0x521   :  { %v1178_v22 = vpop.f32.mrf.mxu0 }
 0x522   :  { %v836_v27 = vadd.f32 %v830_v23, %v1458_v3  ;;  %v1246_v3 = vld [vmem:[%s1617_s6] sm:$0xff]   ;;  %s1387_s6 = smov [#allocation8]  }
 0x523   :  { %v832_v24 = vpop.f32.mrf.mxu0  ;;  %1195 = vmatpush3.bf16.msra.mxu0 %v1246_v3  ;;  %s1037_s22 = sshll.u32 %s1387_s6, 4  ;;  %s1038_s22 = int_to_ptr.vmem [resolvable:$true] %s1037_s22 }
 0x524   :  { %v833_v25 = vadd.f32 %v832_v24, %v779_v20  ;;  %s1343_s23 = scalar_lea.vmem %s1038_s22, 256  ;;  %p1348_p2 = scmp.lt.s32.totalorder %s1038_s22, %s1038_s22 }
 0x525   :  { %v1179_v26 = vpop.f32.mrf.mxu0  ;;  %p1344_p1 = scmp.ne.s32.totalorder %s1038_s22, %s1343_s23  ;;  %p1349_p3 = scmp.lt.s32.totalorder %s1343_s23, %s1343_s23 }
 0x526   :  { %v837_v28 = vadd.f32 %v833_v25, %v1463_v4  ;;  %v845_v4 = vsub.s32 1, %v1479_v11 }
 0x527   :  { %p1350_p4 = por %p1349_p3, %p1348_p2 }
 0x528   :  { %v838_v29 = vpack.c.bf16 %v837_v28, %v836_v27  ;;  %v846_v32 = vrot.slane %v1485_v13, %v845_v4 }
 0x529   :  { %p1351_p5 = pnand %p1350_p4, %p1344_p1 }
 0x52a   :  { %1185 = vmatmul.mubr.msk.bf16.vlgmr.msra.gmra.mxu1 %vm100_vm1, %v838_v29 }
 0x5ea   :  { %v896_v33 = vpop.f32.mrf.mxu1 }
 0x5eb   :  { %v897_v35 = vadd.f32 %v896_v33, %v846_v32 }
 0x5ec   :  { %v1186_v34 = vpop.f32.mrf.mxu1 }
 0x5ed   :  { %v903_v39 = vmax.f32 %v897_v35, 0.0 }
 0x5ee   :  { %v899_v36 = vpop.f32.mrf.mxu1 }
 0x5ef   :  { %v900_v37 = vadd.f32 %v899_v36, %v846_v32 }
 0x5f0   :  { %v1187_v38 = vpop.f32.mrf.mxu1 }
 0x5f1   :  { %v904_v40 = vmax.f32 %v900_v37, 0.0 }
 0x5f3   :  { %v905_v41 = vpack.c.bf16 %v904_v40, %v903_v39 }
 0x5f5   :  { %1197 = vmatmul.mubr.msk.bf16.vlgmr.msra.gmra.mxu0 %vm938_vm7, %v905_v41 }
 0x6b5   :  { %v976_v43 = vpop.f32.mrf.mxu0 }
 0x6b6   :  { %v983_v44 = vadd.f32 %v976_v43, %v836_v27 }
 0x6b7   :  { %v1198_v45 = vpop.f32.mrf.mxu0 }
 0x6b8   :  { %v989_v46 = vadd.f32 %v988_v42, %v983_v44 }
 0x6b9   :  { %v979_v47 = vpop.f32.mrf.mxu0 }
 0x6ba   :  { %v984_v48 = vadd.f32 %v979_v47, %v837_v28  ;;  %v991_v49 = vsel %vm100_vm1, %v989_v46, 0.0 }
 0x6bb   :  { %992 = vadd.xlane.f32.xlu1 %v991_v49  ;;  %v1199_v50 = vpop.f32.mrf.mxu0 }
 0x6bc   :  { %v990_v51 = vadd.f32 %v988_v42, %v984_v48 }
 0x6be   :  { %v994_v52 = vsel %vm100_vm1, %v990_v51, 0.0 }
 0x6bf   :  { %995 = vadd.xlane.f32.xlu0 %v994_v52 }
 0x744   :  { %v993_v53 = vpop.xlane.xlu1 %992 }
 0x745   :  { %v998_v54 = vmul.f32 0.03125, %v993_v53 }
 0x747   :  { %v1000_v55 = vsub.f32 %v989_v46, %v998_v54 }
 0x748   :  { %v996_v56 = vpop.xlane.xlu0 %995 }
 0x749   :  { %v999_v57 = vmul.f32 0.03125, %v996_v56  ;;  %v1002_v58 = vmul.f32 %v1000_v55, %v1000_v55 }
 0x74b   :  { %v1001_v59 = vsub.f32 %v990_v51, %v999_v57  ;;  %v1004_v60 = vsel %vm100_vm1, %v1002_v58, 0.0 }
 0x74c   :  { %1005 = vadd.xlane.f32.xlu0 %v1004_v60 }
 0x74d   :  { %v1003_v61 = vmul.f32 %v1001_v59, %v1001_v59 }
 0x74f   :  { %v1007_v62 = vsel %vm100_vm1, %v1003_v61, 0.0 }
 0x750   :  { %1008 = vadd.xlane.f32.xlu1 %v1007_v62 }
 0x7d5   :  { %v1006_v63 = vpop.xlane.xlu0 %1005 }
 0x7d6   :  { %v1010_v1 = vmul.f32 0.03125, %v1006_v63 }
 0x7d8   :  { %v1012_v2 = vadd.f32 1e-05, %v1010_v1 }
 0x7d9   :  { %v1009_v5 = vpop.xlane.xlu1 %1008 }
 0x7da   :  { %1279 = vrsqrt.f32 %v1012_v2  ;;  %v1011_v6 = vmul.f32 0.03125, %v1009_v5 }
 0x7dc   :  { %v1013_v7 = vadd.f32 1e-05, %v1011_v6 }
 0x7de   :  { %1281 = vrsqrt.f32 %v1013_v7 }
 0x7e7   :  { %v1280_v12 = vpop.eup %1279 }
 0x7e8   :  { %v1016_v14 = vmul.f32 %v1280_v12, %v1000_v55 }
 0x7ea   :  { %v1022_v16 = vmul.f32 %v1021_v10, %v1016_v14 }
 0x7eb   :  { %v1282_v17 = vpop.eup %1281 }
 0x7ec   :  { %v1017_v18 = vmul.f32 %v1282_v17, %v1001_v59  ;;  %v1028_v19 = vadd.f32 %v1027_v15, %v1022_v16 }
 0x7ee   :  { %v1023_v20 = vmul.f32 %v1021_v10, %v1017_v18  ;;  %1030 = vst.msk [vmem:[#allocation8] sm:$0xff] %vm100_vm1, %v1028_v19 }
 0x7f0   :  { %v1029_v21 = vadd.f32 %v1027_v15, %v1023_v20 }
 0x7f2   :  { %1031 = vst.msk [vmem:[#allocation8 + $0x8] sm:$0xff] %vm100_vm1, %v1029_v21 }
 0x7f3   :  { %1354 = shalt.err (!%p1351_p5)
}
 0x7f4   :  { %s1388_s24 = smov 128  }
 0x7f5   :  { %1043 = dma.vmem_to_hbm [thread:$0]  %s1038_s22, 256, %s1619_s8, [#allocation4], %s1388_s24, %s1388_s24, %s1384_s14  }
 0x7f6   :  { %1367 = dma.done.wait [#allocation4], 256  }
 0x7f7   :  { %1368 = vsyncadd [#allocation4], 4294967040 }
 0x7f8   :  { %1047 = vsyncpa [#allocation3], 1 }
 0x7f9   :  { %1048 = vsyncpa [#allocation6], 1 }
 0x7fa   :  { %1049 = vsyncpa [#allocation4], 1 }

</bundles_post_ra>
